<compile_context>
chip_gen: v5e
topology: v5e:2x2
jax: 0.10.0
libtpu: 0.0.40
codegen_flags: <defaults>
</compile_context>

<pallas_src>
import functools

import jax
import jax.numpy as jnp
from jax.experimental import pallas as pl
from jax.experimental.pallas import tpu as pltpu

LANE = 128      # vreg lane width
SUBLANE = 8     # f32 sublane count


def _round_up(x, m):
    return ((x + m - 1) // m) * m


# ----------------------------- Pallas kernel ------------------------------

def _make_fused_mlp_kernel(num_hidden):
    """Fused (Linear+BN+ReLU) * num_hidden + Linear(out) kernel."""

    def kernel(*refs):
        x_ref = refs[0]
        o_ref = refs[-1]
        p = refs[1:-1]                      # [w0, b0, w1, b1, ..., w_out, b_out]

        h = x_ref[...]
        for i in range(num_hidden):
            w = p[2 * i][...]
            b = p[2 * i + 1][...]           # (1, H) f32
            acc = jnp.dot(h.astype(w.dtype), w,
                          preferred_element_type=jnp.float32)
            # f32 epilogue (bias + relu); BN already folded into w/b.
            h = jnp.maximum(acc + b, 0.0)

        w_out = p[2 * num_hidden][...]      # (H_last, LANE)  (padded, lane-dense)
        b_out = p[2 * num_hidden + 1][...]  # (1, LANE)
        y = jnp.dot(h.astype(w_out.dtype), w_out,
                    preferred_element_type=jnp.float32) + b_out
        o_ref[...] = y.astype(o_ref.dtype)

    return kernel


def _fused_mlp_pallas(x_pad, folded, batch_tile):
    """x_pad: (B_pad, D) with B_pad % batch_tile == 0. Returns (B_pad, LANE)."""
    B_pad, D = x_pad.shape
    num_hidden = len(folded) // 2 - 1
    TB = batch_tile
    grid = (B_pad // TB,)

    in_specs = [pl.BlockSpec((TB, D), lambda i: (i, 0))]
    for arr in folded:
        # Weights / biases: full-array block, resident across all grid steps.
        in_specs.append(pl.BlockSpec(arr.shape, lambda i: (0, 0)))

    return pl.pallas_call(
        _make_fused_mlp_kernel(num_hidden),
        out_shape=jax.ShapeDtypeStruct((B_pad, LANE), jnp.float32),
        grid=grid,
        in_specs=in_specs,
        out_specs=pl.BlockSpec((TB, LANE), lambda i: (i, 0)),
        compiler_params=pltpu.CompilerParams(
            dimension_semantics=("parallel",)),
    )(x_pad, *folded)


# ------------------------------ JAX wrappers ------------------------------

def init_mlp_params(key, input_dim, embed_dims, output_layer=True):
    """Deterministic parameter init matching the PyTorch layer shapes."""
    params = []
    d_in = input_dim
    for h in embed_dims:
        key, kw, kb, kg, kbeta = jax.random.split(key, 5)
        bound = 1.0 / jnp.sqrt(d_in)
        # Linear: PyTorch stores weight as (out, in); we keep it pre-transposed (in, out).
        w = jax.random.uniform(kw, (d_in, h), jnp.float32, -bound, bound)
        b = jax.random.uniform(kb, (1, h), jnp.float32, -bound, bound)
        gamma = 1.0 + 0.1 * jax.random.normal(kg, (1, h), jnp.float32)
        beta = 0.1 * jax.random.normal(kbeta, (1, h), jnp.float32)
        running_mean = jnp.zeros((1, h), jnp.float32)
        running_var = jnp.ones((1, h), jnp.float32)
        params.append(dict(w=w, b=b, gamma=gamma, beta=beta,
                           running_mean=running_mean, running_var=running_var))
        d_in = h
    out_params = None
    if output_layer:
        key, kw, kb = jax.random.split(key, 3)
        bound = 1.0 / jnp.sqrt(d_in)
        w = jax.random.uniform(kw, (d_in, 1), jnp.float32, -bound, bound)
        b = jax.random.uniform(kb, (1, 1), jnp.float32, -bound, bound)
        out_params = dict(w=w, b=b)
    return params, out_params


def fold_params(hidden_params, out_params, eps=1e-5, compute_dtype=jnp.float32):
    """One-time fold of eval-mode BatchNorm into the Linear weights/biases,
    and lane-dense padding of the final 1-wide output layer.

    compute_dtype may be jnp.bfloat16 on v6e/v7x to halve weight footprint and
    use the bf16 MXU path (accumulation stays f32 in the kernel)."""
    flat = []
    for p in hidden_params:
        inv_std = jax.lax.rsqrt(p["running_var"] + eps)
        scale = p["gamma"] * inv_std                                   # (1, H)
        w = (p["w"] * scale).astype(compute_dtype)                     # (D_in, H)
        b = ((p["b"] - p["running_mean"]) * scale + p["beta"]).astype(jnp.float32)
        flat += [w, b]
    # Output Linear: pad out-dim 1 -> LANE so the kernel store is lane-dense.
    w_out = out_params["w"]
    b_out = out_params["b"]
    d_in, o = w_out.shape
    w_pad = jnp.zeros((d_in, LANE), compute_dtype).at[:, :o].set(
        w_out.astype(compute_dtype))
    b_pad = jnp.zeros((1, LANE), jnp.float32).at[:, :o].set(
        b_out.astype(jnp.float32))
    flat += [w_pad, b_pad]
    return tuple(flat), int(o)


@functools.partial(jax.jit, static_argnames=("out_width", "batch_tile"))
def mlp_forward(x, folded, out_width=1, batch_tile=256):
    """Fused MLP forward (eval mode). x: (B, D) f32."""
    B, D = x.shape
    # Batch tile: multiple of 8 sublanes, capped by (padded) batch size.
    tb = min(_round_up(batch_tile, SUBLANE), _round_up(B, SUBLANE))
    b_pad = _round_up(B, tb)
    x_pad = x if b_pad == B else jnp.pad(x, ((0, b_pad - B), (0, 0)))
    y = _fused_mlp_pallas(x_pad, folded, tb)
    return y[:B, :out_width]


def mlp_forward_reference(x, hidden_params, out_params, eps=1e-5):
    """Pure-JAX reference of the unfolded PyTorch forward (eval mode)."""
    for p in hidden_params:
        y = x @ p["w"] + p["b"]
        y = (y - p["running_mean"]) / jnp.sqrt(p["running_var"] + eps)
        y = y * p["gamma"] + p["beta"]
        x = jnp.maximum(y, 0.0)
    if out_params is not None:
        x = x @ out_params["w"] + out_params["b"]
    return x


# --------------------------------- driver ---------------------------------

if __name__ == "__main__":
    key = jax.random.PRNGKey(0)

    batch = 8
    input_dim = 16
    embed_dims = (32, 16)
    dropout = 0.2  # identity in eval mode

    key, kx = jax.random.split(key)
    x = jax.random.normal(kx, (batch, input_dim), jnp.float32)

    hidden_params, out_params = init_mlp_params(key, input_dim, embed_dims,
                                                output_layer=True)

    # One-time BN fold + lane-dense padding of the output layer (not in hot path).
    folded, out_width = fold_params(hidden_params, out_params,
                                    compute_dtype=jnp.float32)

    y = mlp_forward(x, folded, out_width=out_width)
    jax.block_until_ready(y)
    assert y.shape == (batch, 1), y.shape

    # Correctness check against the unfolded pure-JAX reference.
    y_ref = mlp_forward_reference(x, hidden_params, out_params)
    assert jnp.allclose(y, y_ref, rtol=1e-4, atol=1e-4), (
        float(jnp.max(jnp.abs(y - y_ref))))

    print("KERNEL_OK")
</pallas_src>

<mosaic_0001>
module attributes {stable_mosaic.version = 11 : i64} {
  func.func @kernel(%arg0: i32, %arg1: memref<8x16xf32, #tpu.memory_space<vmem>>, %arg2: memref<16x32xf32, #tpu.memory_space<vmem>>, %arg3: memref<1x32xf32, #tpu.memory_space<vmem>>, %arg4: memref<32x16xf32, #tpu.memory_space<vmem>>, %arg5: memref<1x16xf32, #tpu.memory_space<vmem>>, %arg6: memref<16x128xf32, #tpu.memory_space<vmem>>, %arg7: memref<1x128xf32, #tpu.memory_space<vmem>>, %arg8: memref<8x128xf32, #tpu.memory_space<vmem>>) attributes {dimension_semantics = [#tpu.dimension_semantics<parallel>], iteration_bounds = array<i64: 1>, scalar_prefetch = 0 : i64, scratch_operands = 0 : i64, tpu.core_type = #tpu.core_type<tc>, window_params = [{transform_indices = @transform_0, window_bounds = array<i64: 8, 16>}, {pipeline_mode = #tpu.pipeline_mode<synchronous>, transform_indices = @transform_1, window_bounds = array<i64: 16, 32>}, {pipeline_mode = #tpu.pipeline_mode<synchronous>, transform_indices = @transform_2, window_bounds = array<i64: 1, 32>}, {pipeline_mode = #tpu.pipeline_mode<synchronous>, transform_indices = @transform_3, window_bounds = array<i64: 32, 16>}, {pipeline_mode = #tpu.pipeline_mode<synchronous>, transform_indices = @transform_4, window_bounds = array<i64: 1, 16>}, {pipeline_mode = #tpu.pipeline_mode<synchronous>, transform_indices = @transform_5, window_bounds = array<i64: 16, 128>}, {pipeline_mode = #tpu.pipeline_mode<synchronous>, transform_indices = @transform_6, window_bounds = array<i64: 1, 128>}, {transform_indices = @transform_7, window_bounds = array<i64: 8, 128>}]} {
    %c0 = arith.constant 0 : index
    %c0_0 = arith.constant 0 : index
    %0 = vector.load %arg1[%c0, %c0_0] : memref<8x16xf32, #tpu.memory_space<vmem>>, vector<8x16xf32>
    %c0_1 = arith.constant 0 : index
    %c0_2 = arith.constant 0 : index
    %1 = vector.load %arg2[%c0_1, %c0_2] : memref<16x32xf32, #tpu.memory_space<vmem>>, vector<16x32xf32>
    %c0_3 = arith.constant 0 : index
    %c0_4 = arith.constant 0 : index
    %2 = vector.load %arg3[%c0_3, %c0_4] : memref<1x32xf32, #tpu.memory_space<vmem>>, vector<1x32xf32>
    %cst = arith.constant dense<0.000000e+00> : vector<8x32xf32>
    %3 = tpu.matmul %0, %1, %cst {dimension_numbers = #tpu.dot_dimension_numbers<[1], [0], [0], [1], [0, 0, 1, 1], [], []>} : vector<8x16xf32>, vector<16x32xf32>, vector<8x32xf32> -> vector<8x32xf32>
    %4 = vector.broadcast %2 : vector<1x32xf32> to vector<8x32xf32>
    %5 = arith.addf %3, %4 : vector<8x32xf32>
    %cst_5 = arith.constant 0.000000e+00 : f32
    %6 = vector.broadcast %cst_5 : f32 to vector<8x32xf32>
    %7 = arith.maximumf %5, %6 : vector<8x32xf32>
    %c0_6 = arith.constant 0 : index
    %c0_7 = arith.constant 0 : index
    %8 = vector.load %arg4[%c0_6, %c0_7] : memref<32x16xf32, #tpu.memory_space<vmem>>, vector<32x16xf32>
    %c0_8 = arith.constant 0 : index
    %c0_9 = arith.constant 0 : index
    %9 = vector.load %arg5[%c0_8, %c0_9] : memref<1x16xf32, #tpu.memory_space<vmem>>, vector<1x16xf32>
    %cst_10 = arith.constant dense<0.000000e+00> : vector<8x16xf32>
    %10 = tpu.matmul %7, %8, %cst_10 {dimension_numbers = #tpu.dot_dimension_numbers<[1], [0], [0], [1], [0, 0, 1, 1], [], []>} : vector<8x32xf32>, vector<32x16xf32>, vector<8x16xf32> -> vector<8x16xf32>
    %11 = vector.broadcast %9 : vector<1x16xf32> to vector<8x16xf32>
    %12 = arith.addf %10, %11 : vector<8x16xf32>
    %cst_11 = arith.constant 0.000000e+00 : f32
    %13 = vector.broadcast %cst_11 : f32 to vector<8x16xf32>
    %14 = arith.maximumf %12, %13 : vector<8x16xf32>
    %c0_12 = arith.constant 0 : index
    %c0_13 = arith.constant 0 : index
    %15 = vector.load %arg6[%c0_12, %c0_13] : memref<16x128xf32, #tpu.memory_space<vmem>>, vector<16x128xf32>
    %c0_14 = arith.constant 0 : index
    %c0_15 = arith.constant 0 : index
    %16 = vector.load %arg7[%c0_14, %c0_15] : memref<1x128xf32, #tpu.memory_space<vmem>>, vector<1x128xf32>
    %cst_16 = arith.constant dense<0.000000e+00> : vector<8x128xf32>
    %17 = tpu.matmul %14, %15, %cst_16 {dimension_numbers = #tpu.dot_dimension_numbers<[1], [0], [0], [1], [0, 0, 1, 1], [], []>} : vector<8x16xf32>, vector<16x128xf32>, vector<8x128xf32> -> vector<8x128xf32>
    %18 = vector.broadcast %16 : vector<1x128xf32> to vector<8x128xf32>
    %19 = arith.addf %17, %18 : vector<8x128xf32>
    %c0_17 = arith.constant 0 : index
    %c0_18 = arith.constant 0 : index
    %20 = vector.load %arg8[%c0_17, %c0_18] : memref<8x128xf32, #tpu.memory_space<vmem>>, vector<8x128xf32>
    tpu.vector_store %arg8[%c0_17, %c0_18], %19 {strides = array<i32>} : memref<8x128xf32, #tpu.memory_space<vmem>>, vector<8x128xf32>,
    return
  }
  func.func @transform_0(%arg0: i32) -> (i32, i32) {
    %c0_i32 = arith.constant 0 : i32
    %c0_i32_0 = arith.constant 0 : i32
    return %arg0, %c0_i32 : i32, i32
  }
  func.func @transform_1(%arg0: i32) -> (i32, i32) {
    %c0_i32 = arith.constant 0 : i32
    %c0_i32_0 = arith.constant 0 : i32
    %c0_i32_1 = arith.constant 0 : i32
    return %c0_i32, %c0_i32_0 : i32, i32
  }
  func.func @transform_2(%arg0: i32) -> (i32, i32) {
    %c0_i32 = arith.constant 0 : i32
    %c0_i32_0 = arith.constant 0 : i32
    %c0_i32_1 = arith.constant 0 : i32
    return %c0_i32, %c0_i32_0 : i32, i32
  }
  func.func @transform_3(%arg0: i32) -> (i32, i32) {
    %c0_i32 = arith.constant 0 : i32
    %c0_i32_0 = arith.constant 0 : i32
    %c0_i32_1 = arith.constant 0 : i32
    return %c0_i32, %c0_i32_0 : i32, i32
  }
  func.func @transform_4(%arg0: i32) -> (i32, i32) {
    %c0_i32 = arith.constant 0 : i32
    %c0_i32_0 = arith.constant 0 : i32
    %c0_i32_1 = arith.constant 0 : i32
    return %c0_i32, %c0_i32_0 : i32, i32
  }
  func.func @transform_5(%arg0: i32) -> (i32, i32) {
    %c0_i32 = arith.constant 0 : i32
    %c0_i32_0 = arith.constant 0 : i32
    %c0_i32_1 = arith.constant 0 : i32
    return %c0_i32, %c0_i32_0 : i32, i32
  }
  func.func @transform_6(%arg0: i32) -> (i32, i32) {
    %c0_i32 = arith.constant 0 : i32
    %c0_i32_0 = arith.constant 0 : i32
    %c0_i32_1 = arith.constant 0 : i32
    return %c0_i32, %c0_i32_0 : i32, i32
  }
  func.func @transform_7(%arg0: i32) -> (i32, i32) {
    %c0_i32 = arith.constant 0 : i32
    %c0_i32_0 = arith.constant 0 : i32
    return %arg0, %c0_i32 : i32, i32
  }
}

</mosaic_0001>

<bundles_post_ra>
// kernel: mlp_forward.1
= control target key start
LH: loop header
LB: loop body
LE: loop exit
PB: predicated region body
PF: predicated region fallthrough
CT: control target
= control target key end

     0   :  { %vm33_vm0 = vcmask 130048   ;;  %vm66_vm1 = vcmask 261120   ;;  %s212_s1 = inlined_call_operand.vmem [shape: f32[16,32], index: 1, kind: input, shape index: {}]   ;;  %s213_s0 = inlined_call_operand.vmem [shape: f32[8,16], index: 0, kind: input, shape index: {}]   ;;  %s214_s3 = inlined_call_operand.vmem [shape: f32[32,16], index: 3, kind: input, shape index: {}]   ;;  %s215_s2 = inlined_call_operand.vmem [shape: f32[1,32], index: 2, kind: input, shape index: {}]   ;;  %s216_s4 = inlined_call_operand.vmem [shape: f32[1,16], index: 4, kind: input, shape index: {}]   ;;  %s217_s6 = inlined_call_operand.vmem [shape: f32[1,128], index: 6, kind: input, shape index: {}]   ;;  %s218_s5 = inlined_call_operand.vmem [shape: f32[16,128], index: 5, kind: input, shape index: {}]   ;;  %s219_s7 = inlined_call_operand.vmem [shape: f32[8,128], index: 7, kind: output, shape index: {}]  }
   0x1   :  { %v28_v0 = vld [vmem:[%s212_s1 + $0x8] sm:$0xff]  ;;  %v27_v1 = vld [vmem:[%s212_s1] sm:$0xff]  ;;  %v61_v3 = vld [vmem:[%s214_s3 + $0x18] sm:$0xff] }
   0x2   :  { %51 = vmatpush.msra.mxu0 %v28_v0  ;;  %v26_v2 = vld [vmem:[%s213_s0] sm:$0xff]  ;;  %82 = vmatpush.msra.mxu1 %v61_v3  ;;  %v60_v4 = vld [vmem:[%s214_s3 + $0x10] sm:$0xff]  ;;  %v59_v5 = vld [vmem:[%s214_s3 + $0x8] sm:$0xff] }
   0x3   :  { %v58_v6 = vld [vmem:[%s214_s3] sm:$0xff]  ;;  %v92_v11 = vld [vmem:[%s218_s5 + $0x8] sm:$0xff] }
   0x4   :  { %52 = vmatpush.msra.mxu0 %v27_v1  ;;  %83 = vmatpush.msra.mxu1 %v60_v4  ;;  %v128_v7 = vld [vmem:[%s215_s2] ss:$0 sm:$0xff] }
   0x5   :  { %125 = vmatmul.msk.f32.vlgmr.msra.gmra.mxu0 %vm33_vm0, %v26_v2  ;;  %114 = vmatpush.msra.mxu2 %v92_v11  ;;  %v91_v12 = vld [vmem:[%s218_s5] sm:$0xff] }
   0x6   :  { %84 = vmatpush.msra.mxu1 %v59_v5  ;;  %v129_v13 = vld [vmem:[%s216_s4] ss:$0 sm:$0xff] }
   0x7   :  { %115 = vmatpush.msra.mxu2 %v91_v12  ;;  %v130_v17 = vld [vmem:[%s217_s6] ss:$0 sm:$0xff] }
   0x8   :  { %85 = vmatpush.msra.mxu1 %v58_v6 }
  0x82   :  { %v54_v8 = vpop.f32.mrf.mxu0 }
  0x83   :  { %v55_v9 = vadd.f32 %v128_v7, %v54_v8 }
  0x85   :  { %v57_v10 = vmax.f32 %v55_v9, 0.0 }
  0x87   :  { %126 = vmatmul.msk.f32.vlgmr.msra.gmra.mxu1 %vm66_vm1, %v57_v10 }
 0x104   :  { %v87_v14 = vpop.f32.mrf.mxu1 }
 0x105   :  { %v88_v15 = vadd.f32 %v129_v13, %v87_v14 }
 0x107   :  { %v90_v16 = vmax.f32 %v88_v15, 0.0 }
 0x109   :  { %127 = vmatmul.msk.f32.vlgmr.msra.gmra.mxu2 %vm33_vm0, %v90_v16 }
 0x18c   :  { %v117_v18 = vpop.f32.mrf.mxu2 }
 0x18d   :  { %v118_v19 = vadd.f32 %v130_v17, %v117_v18 }
 0x18f   :  { %120 = vst [vmem:[%s219_s7] sm:$0xff] %v118_v19 }

</bundles_post_ra>
